<compile_context>
chip_gen: v6e
topology: v6e:2x2x1
jax: 0.10.0
libtpu: 0.0.40
codegen_flags: <defaults>
</compile_context>

<pallas_src>
import functools

import numpy as np

import jax
import jax.numpy as jnp
from jax import lax
from jax.experimental import pallas as pl
from jax.experimental.pallas import tpu as pltpu

_LANES = 128
_NEG = -1e30  # large finite negative; avoids exp(-inf - -inf) = NaN corner cases

_FLAG_FIRST = 1    # first visited kv block of this q block -> init scratch
_FLAG_LAST = 2     # last visited kv block of this q block  -> finalize output
_FLAG_PARTIAL = 4  # tile is not fully allowed -> rebuild the analytic mask
_FLAG_RAND = 8     # partial tile where random columns actually add entries


def _round_up(x, m):
    return (x + m - 1) // m * m


# ---------------------------------------------------------------------------
# Kernel 1: fused QKV projection   (rows, C) @ (C, 3*Hp) -> 3 x (rows, Hp) bf16
# ---------------------------------------------------------------------------
def _qkv_proj_kernel(x_ref, w_ref, q_ref, k_ref, v_ref, *, hp):
    # One MXU pass per row tile; f32 accumulation, bf16 lane-dense stores.
    y = jnp.dot(x_ref[...], w_ref[...], preferred_element_type=jnp.float32)
    q_ref[...] = y[:, :hp].astype(q_ref.dtype)
    k_ref[...] = y[:, hp:2 * hp].astype(k_ref.dtype)
    v_ref[...] = y[:, 2 * hp:].astype(v_ref.dtype)


def _qkv_projection(x2d, w_all, hp, row_tile):
    rows, c = x2d.shape
    return pl.pallas_call(
        functools.partial(_qkv_proj_kernel, hp=hp),
        out_shape=[jax.ShapeDtypeStruct((rows, hp), jnp.bfloat16)] * 3,
        grid_spec=pltpu.PrefetchScalarGridSpec(
            num_scalar_prefetch=0,
            grid=(rows // row_tile,),
            in_specs=[
                pl.BlockSpec((row_tile, c), lambda i: (i, 0)),
                pl.BlockSpec((c, 3 * hp), lambda i: (0, 0)),
            ],
            out_specs=[pl.BlockSpec((row_tile, hp), lambda i: (i, 0))] * 3,
        ),
        compiler_params=pltpu.CompilerParams(
            dimension_semantics=("parallel",)),
    )(x2d, w_all)


# ---------------------------------------------------------------------------
# Kernel 2: block-sparse flash attention with in-kernel Big-Bird mask
# ---------------------------------------------------------------------------
def _attn_kernel(qblk_ref, kvblk_ref, flag_ref, q_ref, k_ref, v_ref, rand_ref,
                 o_ref, m_scr, l_scr, acc_scr,
                 *, blk, seq_len, window_size, num_global, num_rand):
    t = pl.program_id(1)
    flags = flag_ref[t]
    is_first = (flags & _FLAG_FIRST) != 0
    is_last = (flags & _FLAG_LAST) != 0
    is_partial = (flags & _FLAG_PARTIAL) != 0
    use_rand = (flags & _FLAG_RAND) != 0

    @pl.when(is_first)
    def _init():
        m_scr[...] = jnp.full_like(m_scr, _NEG)
        l_scr[...] = jnp.zeros_like(l_scr)
        acc_scr[...] = jnp.zeros_like(acc_scr)

    q = q_ref[0]                      # (blk, Hp) bf16, 1/sqrt(H) pre-folded
    k = k_ref[0]                      # (blk, Hp) bf16
    v = v_ref[0]                      # (blk, Hp) bf16

    # QK^T: contract the head axis of both operands (no in-kernel transpose).
    s = lax.dot_general(q, k, (((1,), (1,)), ((), ())),
                        preferred_element_type=jnp.float32)      # (blk, blk)

    def update(s_tile, mask):
        # Online (flash) softmax update; running stats are (blk, 1) columns.
        m_prev = m_scr[...]
        m_next = jnp.maximum(m_prev, jnp.max(s_tile, axis=-1, keepdims=True))
        alpha = jnp.exp(m_prev - m_next)
        p = jnp.exp(s_tile - m_next)
        if mask is not None:
            p = jnp.where(mask, p, 0.0)           # load-bearing: exact zeros
        l_scr[...] = alpha * l_scr[...] + jnp.sum(p, axis=-1, keepdims=True)
        acc_scr[...] = alpha * acc_scr[...] + lax.dot_general(
            p.astype(v.dtype), v, (((1,), (0,)), ((), ())),
            preferred_element_type=jnp.float32)
        m_scr[...] = m_next

    # FULL tiles: host guarantees every (row, col) pair of the tile is allowed.
    # Skip the whole mask rebuild — just the two matmuls + softmax update.
    @pl.when(jnp.logical_not(is_partial))
    def _full():
        update(s, None)

    @pl.when(is_partial)
    def _partial():
        row = qblk_ref[t] * blk + lax.broadcasted_iota(jnp.int32, (blk, blk), 0)
        col = kvblk_ref[t] * blk + lax.broadcasted_iota(jnp.int32, (blk, blk), 1)
        causal = col <= row
        allowed = col >= row - (window_size - 1)          # local sliding window
        if num_global > 0:
            allowed = allowed | (row < num_global) | (col < num_global)

        def finish(allow):
            mask = allow & causal
            if seq_len % blk != 0:
                mask = mask & (col < seq_len)             # drop padded key cols
            update(jnp.where(mask, s, _NEG), mask)

        if num_rand > 0:
            # Only tiles where random columns actually add entries pay for the
            # unrolled per-column compares.
            @pl.when(use_rand)
            def _with_rand():
                a = allowed
                r_cols = rand_ref[...]                    # (blk, 128) int32
                for r in range(num_rand):
                    a = a | (col == r_cols[:, r:r + 1])
                finish(a)

            @pl.when(jnp.logical_not(use_rand))
            def _without_rand():
                finish(allowed)
        else:
            finish(allowed)

    @pl.when(is_last)
    def _finalize():
        inv = pl.reciprocal(l_scr[...], approx=True)      # EUP, not VALU divide
        o_ref[0] = (acc_scr[...] * inv).astype(o_ref.dtype)


# ---------------------------------------------------------------------------
# Host-side flattened visit schedule: one entry per (q_block, kv_block) visit.
# ---------------------------------------------------------------------------
def _build_visit_schedule(seq_len, t_pad, blk, window_size, num_global, rand_np):
    nblk = t_pad // blk
    nrand = rand_np.shape[1] if rand_np.size else 0
    q_tbl, kv_tbl, flag_tbl = [], [], []
    for qi in range(nblk):
        rows = np.arange(qi * blk, (qi + 1) * blk)
        rows = rows[rows < seq_len]                       # ignore padding rows
        if rows.size == 0:
            continue                                      # outputs are discarded
        rr = rows[:, None]
        visits = []
        for kb in range(qi + 1):                          # block-level causality
            cols = np.arange(kb * blk, (kb + 1) * blk)
            cc = cols[None, :]
            causal = cc <= rr
            allowed = cc >= rr - (window_size - 1)
            if num_global > 0:
                allowed = allowed | (rr < num_global) | (cc < num_global)
            base = allowed & causal & (cc < seq_len)
            if nrand > 0:
                rsel = rand_np[rows]                      # (R, nrand)
                rmask = (cc[..., None] == rsel[:, None, :]).any(-1)
                full = (allowed | rmask) & causal & (cc < seq_len)
            else:
                full = base
            if not full.any():
                continue                                  # unreachable block
            flags = 0
            if not bool(full.all()):
                flags |= _FLAG_PARTIAL
                if bool((full != base).any()):
                    flags |= _FLAG_RAND
            visits.append([kb, flags])
        # window_size >= 1 guarantees the diagonal block is always visited.
        visits[0][1] |= _FLAG_FIRST
        visits[-1][1] |= _FLAG_LAST
        for kb, fl in visits:
            q_tbl.append(qi)
            kv_tbl.append(kb)
            flag_tbl.append(fl)
    return (np.asarray(q_tbl, np.int32), np.asarray(kv_tbl, np.int32),
            np.asarray(flag_tbl, np.int32), len(flag_tbl))


# ---------------------------------------------------------------------------
# Wrapper
# ---------------------------------------------------------------------------
def bigbird_head(x, wk, wq, wv, *, window_size, num_global_tokens, random_cols,
                 block_size=128):
    B, T, C = x.shape
    H = wk.shape[0]
    hp = _round_up(H, _LANES)                             # lane-dense head dim
    blk = min(block_size, _round_up(T, 8))
    T_pad = _round_up(T, blk)
    num_rand = int(random_cols.shape[1]) if random_cols.ndim == 2 else 0
    num_rand = min(num_rand, T)
    assert num_rand <= _LANES, "random-column table is capped at 128 lanes"

    # One-time weight layout: transpose to (C, H), pad heads to 128, fold scale.
    scale = float(H) ** -0.5

    def pad_t(w):
        return jnp.pad(w.T, ((0, 0), (0, hp - H)))        # (C, Hp)

    w_all = jnp.concatenate([pad_t(wq) * scale, pad_t(wk), pad_t(wv)], axis=1)
    w_all = w_all.astype(jnp.bfloat16)                    # (C, 3*Hp)

    # QKV projection over all B*T_pad rows (batch folded into the row axis),
    # rows padded so the MXU LHS tile never degrades below full height.
    x_pad = jnp.pad(x, ((0, 0), (0, T_pad - T), (0, 0))).astype(jnp.bfloat16)
    rows = B * T_pad
    row_tile = min(rows, 512)
    rows_pad = _round_up(rows, row_tile)
    x2d = x_pad.reshape(rows, C)
    if rows_pad != rows:
        x2d = jnp.pad(x2d, ((0, rows_pad - rows), (0, 0)))
    q2, k2, v2 = _qkv_projection(x2d, w_all, hp, row_tile)
    q = q2[:rows].reshape(B, T_pad, hp)
    k = k2[:rows].reshape(B, T_pad, hp)
    v = v2[:rows].reshape(B, T_pad, hp)

    # Small random-column table (lane-padded int32), instead of a (T,T) mask.
    if num_rand > 0:
        rc_np = np.asarray(random_cols, dtype=np.int32)[:, :num_rand]
    else:
        rc_np = np.zeros((T, 0), dtype=np.int32)
    rand_tbl = np.full((T_pad, _LANES), -1, dtype=np.int32)
    if num_rand > 0:
        rand_tbl[:T, :num_rand] = rc_np

    # Flattened block-sparse schedule (host-side), consumed via scalar prefetch.
    q_tbl, kv_tbl, flag_tbl, total_visits = _build_visit_schedule(
        T, T_pad, blk, int(window_size), int(num_global_tokens), rc_np)

    cost = pl.CostEstimate(
        flops=int(4 * B * total_visits * blk * blk * hp),
        transcendentals=int(B * total_visits * blk * blk),
        bytes_accessed=int(B * (3 * T_pad * hp * 2
                                + 2 * total_visits * blk * hp * 2
                                + T_pad * hp * 2)
                           + T_pad * _LANES * 4),
    )

    kernel = functools.partial(
        _attn_kernel, blk=blk, seq_len=T,
        window_size=int(window_size), num_global=int(num_global_tokens),
        num_rand=num_rand)

    out = pl.pallas_call(
        kernel,
        out_shape=jax.ShapeDtypeStruct((B, T_pad, hp), jnp.bfloat16),
        grid_spec=pltpu.PrefetchScalarGridSpec(
            num_scalar_prefetch=3,
            grid=(B, total_visits),
            in_specs=[
                pl.BlockSpec((1, blk, hp),
                             lambda b, t, qb, kb, fl: (b, qb[t], 0)),
                pl.BlockSpec((1, blk, hp),
                             lambda b, t, qb, kb, fl: (b, kb[t], 0)),
                pl.BlockSpec((1, blk, hp),
                             lambda b, t, qb, kb, fl: (b, kb[t], 0)),
                pl.BlockSpec((blk, _LANES),
                             lambda b, t, qb, kb, fl: (qb[t], 0)),
            ],
            out_specs=pl.BlockSpec((1, blk, hp),
                                   lambda b, t, qb, kb, fl: (b, qb[t], 0)),
            scratch_shapes=[
                pltpu.VMEM((blk, 1), jnp.float32),    # running max (column)
                pltpu.VMEM((blk, 1), jnp.float32),    # running sum (column)
                pltpu.VMEM((blk, hp), jnp.float32),   # output accumulator
            ],
        ),
        compiler_params=pltpu.CompilerParams(
            dimension_semantics=("parallel", "arbitrary")),
        cost_estimate=cost,
    )(jnp.asarray(q_tbl), jnp.asarray(kv_tbl), jnp.asarray(flag_tbl),
      q, k, v, jnp.asarray(rand_tbl))

    return out[:, :T, :H].astype(jnp.float32)


# ---------------------------------------------------------------------------
# Pure-JAX reference (mirrors the PyTorch forward, same random columns)
# ---------------------------------------------------------------------------
def _reference_head(x, wk, wq, wv, window_size, num_global_tokens, random_cols):
    B, T, C = x.shape
    H = wk.shape[0]
    k = x @ wk.T
    q = x @ wq.T
    v = x @ wv.T
    scores = jnp.einsum("btd,bsd->bts", q, k) * (float(H) ** -0.5)
    row = jnp.arange(T)[:, None]
    col = jnp.arange(T)[None, :]
    causal = row >= col
    local = (col >= row - window_size + 1) & (col <= row)
    glob = (row < num_global_tokens) | (col < num_global_tokens)
    rand = jnp.zeros((T, T), dtype=bool)
    if random_cols.shape[1] > 0:
        rsel = jnp.broadcast_to(jnp.arange(T)[:, None], random_cols.shape)
        rand = rand.at[rsel, random_cols].set(True)
    final = (local | glob | rand) & causal
    scores = jnp.where(final[None], scores, -jnp.inf)
    probs = jax.nn.softmax(scores, axis=-1)
    return jnp.einsum("bts,bsd->btd", probs, v)


if __name__ == "__main__":
    B, T, C = 2, 8, 32          # batch, sequence length, n_embd
    H = 16                      # head_size
    window_size = 2
    num_global_tokens = 1
    num_random_tokens = 2

    root = jax.random.PRNGKey(0)
    kx, kk, kq, kv_, kr = jax.random.split(root, 5)

    x = jax.random.normal(kx, (B, T, C), dtype=jnp.float32)
    bound = 1.0 / (C ** 0.5)
    wk = jax.random.uniform(kk, (H, C), jnp.float32, -bound, bound)
    wq = jax.random.uniform(kq, (H, C), jnp.float32, -bound, bound)
    wv = jax.random.uniform(kv_, (H, C), jnp.float32, -bound, bound)

    nr = min(num_random_tokens, T)
    random_cols = jax.random.randint(kr, (T, nr), 0, T, dtype=jnp.int32)

    out = bigbird_head(x, wk, wq, wv,
                       window_size=window_size,
                       num_global_tokens=num_global_tokens,
                       random_cols=random_cols)
    out = jax.block_until_ready(out)

    assert out.shape == (B, T, H)
    assert bool(jnp.isfinite(out).all())

    ref = _reference_head(x, wk, wq, wv, window_size, num_global_tokens,
                          random_cols)
    np.testing.assert_allclose(np.asarray(out), np.asarray(ref),
                               rtol=5e-2, atol=5e-2)

    print("KERNEL_OK")
</pallas_src>

<mosaic_0001>
module attributes {stable_mosaic.version = 11 : i64} {
  func.func @_qkv_proj_kernel(%arg0: i32, %arg1: memref<16x32xbf16, #tpu.memory_space<vmem>>, %arg2: memref<32x384xbf16, #tpu.memory_space<vmem>>, %arg3: memref<16x128xbf16, #tpu.memory_space<vmem>>, %arg4: memref<16x128xbf16, #tpu.memory_space<vmem>>, %arg5: memref<16x128xbf16, #tpu.memory_space<vmem>>) attributes {dimension_semantics = [#tpu.dimension_semantics<parallel>], iteration_bounds = array<i64: 1>, scalar_prefetch = 0 : i64, scratch_operands = 0 : i64, tpu.core_type = #tpu.core_type<tc>, window_params = [{transform_indices = @transform_0, window_bounds = array<i64: 16, 32>}, {pipeline_mode = #tpu.pipeline_mode<synchronous>, transform_indices = @transform_1, window_bounds = array<i64: 32, 384>}, {transform_indices = @transform_2, window_bounds = array<i64: 16, 128>}, {transform_indices = @transform_3, window_bounds = array<i64: 16, 128>}, {transform_indices = @transform_4, window_bounds = array<i64: 16, 128>}]} {
    %c0 = arith.constant 0 : index
    %c0_0 = arith.constant 0 : index
    %0 = vector.load %arg1[%c0, %c0_0] : memref<16x32xbf16, #tpu.memory_space<vmem>>, vector<16x32xbf16>
    %c0_1 = arith.constant 0 : index
    %c0_2 = arith.constant 0 : index
    %1 = vector.load %arg2[%c0_1, %c0_2] : memref<32x384xbf16, #tpu.memory_space<vmem>>, vector<32x384xbf16>
    %cst = arith.constant dense<0.000000e+00> : vector<16x384xf32>
    %2 = tpu.matmul %0, %1, %cst {dimension_numbers = #tpu.dot_dimension_numbers<[1], [0], [0], [1], [0, 0, 1, 1], [], []>} : vector<16x32xbf16>, vector<32x384xbf16>, vector<16x384xf32> -> vector<16x384xf32>
    %3 = vector.extract_strided_slice %2 {offsets = [0, 0], sizes = [16, 128], strides = [1, 1]} : vector<16x384xf32> to vector<16x128xf32>
    %4 = arith.truncf %3 : vector<16x128xf32> to vector<16x128xbf16>
    %c0_3 = arith.constant 0 : index
    %c0_4 = arith.constant 0 : index
    %5 = vector.load %arg3[%c0_3, %c0_4] : memref<16x128xbf16, #tpu.memory_space<vmem>>, vector<16x128xbf16>
    tpu.vector_store %arg3[%c0_3, %c0_4], %4 {strides = array<i32>} : memref<16x128xbf16, #tpu.memory_space<vmem>>, vector<16x128xbf16>,
    %6 = vector.extract_strided_slice %2 {offsets = [0, 128], sizes = [16, 128], strides = [1, 1]} : vector<16x384xf32> to vector<16x128xf32>
    %7 = arith.truncf %6 : vector<16x128xf32> to vector<16x128xbf16>
    %c0_5 = arith.constant 0 : index
    %c0_6 = arith.constant 0 : index
    %8 = vector.load %arg4[%c0_5, %c0_6] : memref<16x128xbf16, #tpu.memory_space<vmem>>, vector<16x128xbf16>
    tpu.vector_store %arg4[%c0_5, %c0_6], %7 {strides = array<i32>} : memref<16x128xbf16, #tpu.memory_space<vmem>>, vector<16x128xbf16>,
    %9 = vector.extract_strided_slice %2 {offsets = [0, 256], sizes = [16, 128], strides = [1, 1]} : vector<16x384xf32> to vector<16x128xf32>
    %10 = arith.truncf %9 : vector<16x128xf32> to vector<16x128xbf16>
    %c0_7 = arith.constant 0 : index
    %c0_8 = arith.constant 0 : index
    %11 = vector.load %arg5[%c0_7, %c0_8] : memref<16x128xbf16, #tpu.memory_space<vmem>>, vector<16x128xbf16>
    tpu.vector_store %arg5[%c0_7, %c0_8], %10 {strides = array<i32>} : memref<16x128xbf16, #tpu.memory_space<vmem>>, vector<16x128xbf16>,
    return
  }
  func.func @transform_0(%arg0: i32) -> (i32, i32) {
    %c0_i32 = arith.constant 0 : i32
    %c0_i32_0 = arith.constant 0 : i32
    return %arg0, %c0_i32 : i32, i32
  }
  func.func @transform_1(%arg0: i32) -> (i32, i32) {
    %c0_i32 = arith.constant 0 : i32
    %c0_i32_0 = arith.constant 0 : i32
    %c0_i32_1 = arith.constant 0 : i32
    return %c0_i32, %c0_i32_0 : i32, i32
  }
  func.func @transform_2(%arg0: i32) -> (i32, i32) {
    %c0_i32 = arith.constant 0 : i32
    %c0_i32_0 = arith.constant 0 : i32
    return %arg0, %c0_i32 : i32, i32
  }
  func.func @transform_3(%arg0: i32) -> (i32, i32) {
    %c0_i32 = arith.constant 0 : i32
    %c0_i32_0 = arith.constant 0 : i32
    return %arg0, %c0_i32 : i32, i32
  }
  func.func @transform_4(%arg0: i32) -> (i32, i32) {
    %c0_i32 = arith.constant 0 : i32
    %c0_i32_0 = arith.constant 0 : i32
    return %arg0, %c0_i32 : i32, i32
  }
}

</mosaic_0001>

<bundles_post_ra>
// kernel: tpu_custom_call.1
= control target key start
LH: loop header
LB: loop body
LE: loop exit
PB: predicated region body
PF: predicated region fallthrough
CT: control target
= control target key end

     0   :  { %10 = vsyncpa [#allocation3], 0  ;;  %s499_s0 = inlined_call_operand.hbm [shape: bf16[16,32], index: 0, kind: input, shape index: {}]   ;;  %s500_s1 = inlined_call_operand.hbm [shape: bf16[32,384], index: 1, kind: input, shape index: {}]   ;;  %s501_s2 = inlined_call_operand.hbm [shape: bf16[16,128], index: 2, kind: output, shape index: {0}]   ;;  %s502_s3 = inlined_call_operand.hbm [shape: bf16[16,128], index: 3, kind: output, shape index: {1}]   ;;  %s503_s4 = inlined_call_operand.hbm [shape: bf16[16,128], index: 4, kind: output, shape index: {2}]  }
   0x1   :  { %11 = vsyncpa [#allocation6], 0 }
   0x2   :  { %12 = vsyncpa [#allocation4], 0 }
   0x3   :  { %13 = vsyncpa [#allocation9], 0  ;;  %s435_s15 = smov [#allocation2]  }
   0x4   :  { %s19_s16 = sshll.u32 %s435_s15, 4  ;;  %s20_s16 = int_to_ptr.vmem [resolvable:$true] %s19_s16 }
   0x5   :  { %s335_s17 = scalar_lea.vmem %s20_s16, 128  ;;  %p340_p1 = scmp.lt.s32.totalorder %s20_s16, %s20_s16 }
   0x6   :  { %p336_p0 = scmp.ne.s32.totalorder %s20_s16, %s335_s17  ;;  %p341_p2 = scmp.lt.s32.totalorder %s335_s17, %s335_s17 }
   0x8   :  { %p342_p3 = por %p341_p2, %p340_p1 }
   0xa   :  { %p343_p4 = pnand %p342_p3, %p336_p0 }
   0xc   :  { %346 = shalt.err (!%p343_p4)
}
   0xd   :  { %s436_s18 = smov 64   ;;  %s437_s19 = smov 4  }
   0xe   :  { %25 = dma.hbm_to_vmem [thread:$0]  %s499_s0, 128, %s20_s16, [#allocation3], %s436_s18, %s436_s18, %s437_s19  }
   0xf   :  { %s438_s22 = smov [#allocation5]  }
  0x10   :  { %s31_s23 = sshll.u32 %s438_s22, 4  ;;  %s32_s23 = int_to_ptr.vmem [resolvable:$true] %s31_s23 }
  0x11   :  { %s355_s24 = scalar_lea.vmem %s32_s23, 768  ;;  %p360_p6 = scmp.lt.s32.totalorder %s32_s23, %s32_s23 }
  0x12   :  { %p356_p5 = scmp.ne.s32.totalorder %s32_s23, %s355_s24  ;;  %p361_p7 = scmp.lt.s32.totalorder %s355_s24, %s355_s24 }
  0x14   :  { %p362_p8 = por %p361_p7, %p360_p6 }
  0x16   :  { %p363_p9 = pnand %p362_p8, %p356_p5 }
  0x18   :  { %366 = shalt.err (!%p363_p9)
}
  0x19   :  { %s439_s25 = smov 192   ;;  %s440_s26 = smov 12  }
  0x1a   :  { %37 = dma.hbm_to_vmem [thread:$0]  %s500_s1, 768, %s32_s23, [#allocation6], %s439_s25, %s439_s25, %s440_s26  }
  0x1b   :  { %427 = dma.done.wait [#allocation3], 128  }
  0x1c   :  { %428 = vsyncadd [#allocation3], 4294967168 }
  0x1d   :  { %429 = dma.done.wait [#allocation6], 768  }
  0x1e   :  { %430 = vsyncadd [#allocation6], 4294966528  ;;  %v441_v0 = vmov 0.0   ;;  %vm442_vm0 = vmmov 0   ;;  %v443_v1 = vmov 0   ;;  %v326_v8 = vld [vmem:[#allocation2] sm:$0xff]  }
  0x1f   :  { %298 = vmatprep.subr.bf16.mxu1 %v441_v0  ;;  %302 = vmatprep.mubr.msk.bf16.mxu1 %vm442_vm0, %v441_v0  ;;  %v318_v2 = vld [vmem:[#allocation5 + $0x1c] ss:$12 sps:$4 sm:$0xff]   ;;  %v320_v3 = vld [vmem:[#allocation5 + $0x20] ss:$12 sps:$4 sm:$0xff]   ;;  %v321_v4 = vld [vmem:[#allocation5 + $0x18] ss:$12 sps:$4 sm:$0xff]  }
  0x20   :  { %128 = vmatprep.mubr.bf16.mxu0 %v443_v1  ;;  %108 = vmatprep.subr.bf16.mxu0 %v318_v2  ;;  %v322_v5 = vld [vmem:[#allocation5 + $0x4] ss:$12 sps:$4 sm:$0xff]   ;;  %v324_v6 = vld [vmem:[#allocation5 + $0x8] ss:$12 sps:$4 sm:$0xff]   ;;  %v325_v7 = vld [vmem:[#allocation5] ss:$12 sps:$4 sm:$0xff]  }
  0x21   :  { %299 = vmatpush3.bf16.msra.mxu1 %v320_v3  ;;  %109 = vmatpush1.bf16.msra.mxu0 %v321_v4  ;;  %vm92_vm1 = vcmask 261120   ;;  %s444_s0 = smov [#allocation7]   ;;  %s445_s29 = smov [#allocation8]  }
  0x22   :  { %300 = vmatprep.subr.bf16.mxu1 %v441_v0  ;;  %110 = vmatprep.subr.bf16.mxu0 %v322_v5  ;;  %s215_s1 = sshll.u32 %s444_s0, 4  ;;  %s227_s30 = sshll.u32 %s445_s29, 4  ;;  %s216_s1 = int_to_ptr.vmem [resolvable:$true] %s215_s1  ;;  %s228_s30 = int_to_ptr.vmem [resolvable:$true] %s227_s30 }
  0x23   :  { %s446_s5 = smov [#allocation10]   ;;  %s367_s7 = scalar_lea.vmem %s216_s1, 128 }
  0x24   :  { %s239_s6 = sshll.u32 %s446_s5, 4  ;;  %p368_p10 = scmp.ne.s32.totalorder %s216_s1, %s367_s7  ;;  %s240_s6 = int_to_ptr.vmem [resolvable:$true] %s239_s6 }
  0x25   :  { %301 = vmatpush3.bf16.msra.mxu1 %v324_v6  ;;  %111 = vmatpush1.bf16.msra.mxu0 %v325_v7  ;;  %p372_p11 = scmp.lt.s32.totalorder %s216_s1, %s216_s1  ;;  %p373_p12 = scmp.lt.s32.totalorder %s367_s7, %s367_s7 }
  0x27   :  { %p374_p13 = por %p373_p12, %p372_p11 }
  0x28   :  { %303 = vmatmul.mubr.msk.bf16.vlgmr.msra.gmra.mxu1 %vm92_vm1, %v326_v8  ;;  %266 = vmatmul.mubr.msk.bf16.vlgmr.msra.gmra.mxu0 %vm92_vm1, %v326_v8 }
  0x29   :  { %p375_p0 = pnand %p374_p13, %p368_p10 }
  0xe8   :  { %v173_v9 = vpop.f32.mrf.mxu1  ;;  %v130_v10 = vpop.f32.mrf.mxu0 }
  0xea   :  { %v304_v11 = vpop.f32.mrf.mxu1  ;;  %v132_v12 = vpop.f32.mrf.mxu0 }
  0xec   :  { %v176_v13 = vpop.f32.mrf.mxu1  ;;  %v134_v15 = vpop.f32.mrf.mxu0 }
  0xed   :  { %v293_v14 = vpack.c.bf16 %v176_v13, %v173_v9  ;;  %v283_v16 = vpack.c.bf16 %v134_v15, %v130_v10 }
  0xee   :  { %v305_v17 = vpop.f32.mrf.mxu1  ;;  %v136_v18 = vpop.f32.mrf.mxu0 }
  0xef   :  { %294 = vst [vmem:[#allocation10] sm:$0xff] %v293_v14   ;;  %284 = vst [vmem:[#allocation7] sm:$0xff] %v283_v16   ;;  %v288_v19 = vpack.c.bf16 %v136_v18, %v132_v12 }
  0xf0   :  { %378 = shalt.err (!%p375_p0)
}
  0xf1   :  { %221 = dma.vmem_to_hbm [thread:$0]  %s216_s1, 128, %s501_s2, [#allocation4], %s436_s18, %s436_s18, %s437_s19   ;;  %289 = vst [vmem:[#allocation8] sm:$0xff] %v288_v19  }
  0xf2   :  { %s387_s10 = scalar_lea.vmem %s228_s30, 128  ;;  %p392_p2 = scmp.lt.s32.totalorder %s228_s30, %s228_s30 }
  0xf3   :  { %p388_p1 = scmp.ne.s32.totalorder %s228_s30, %s387_s10  ;;  %p393_p3 = scmp.lt.s32.totalorder %s387_s10, %s387_s10 }
  0xf5   :  { %p394_p4 = por %p393_p3, %p392_p2 }
  0xf7   :  { %p395_p5 = pnand %p394_p4, %p388_p1 }
  0xf9   :  { %398 = shalt.err (!%p395_p5)
}
  0xfa   :  { %233 = dma.vmem_to_hbm [thread:$0]  %s228_s30, 128, %s502_s3, [#allocation9], %s436_s18, %s436_s18, %s437_s19  }
  0xfb   :  { %s407_s13 = scalar_lea.vmem %s240_s6, 128  ;;  %p412_p7 = scmp.lt.s32.totalorder %s240_s6, %s240_s6 }
  0xfc   :  { %p408_p6 = scmp.ne.s32.totalorder %s240_s6, %s407_s13  ;;  %p413_p8 = scmp.lt.s32.totalorder %s407_s13, %s407_s13 }
  0xfe   :  { %p414_p9 = por %p413_p8, %p412_p7 }
 0x100   :  { %p415_p10 = pnand %p414_p9, %p408_p6 }
 0x102   :  { %418 = shalt.err (!%p415_p10)
}
 0x103   :  { %245 = dma.vmem_to_hbm [thread:$0]  %s240_s6, 128, %s503_s4, [#allocation9], %s436_s18, %s436_s18, %s437_s19  }
 0x104   :  { %431 = dma.done.wait [#allocation4], 128  }
 0x105   :  { %432 = vsyncadd [#allocation4], 4294967168 }
 0x106   :  { %433 = dma.done.wait [#allocation9], 256  }
 0x107   :  { %434 = vsyncadd [#allocation9], 4294967040 }
 0x108   :  { %255 = vsyncpa [#allocation3], 1 }
 0x109   :  { %256 = vsyncpa [#allocation6], 1 }
 0x10a   :  { %257 = vsyncpa [#allocation4], 1 }
 0x10b   :  { %258 = vsyncpa [#allocation9], 1 }

</bundles_post_ra>
